<compile_context>
chip_gen: v6e
topology: v6e:2x2x1
jax: 0.10.0
libtpu: 0.0.40
codegen_flags: <defaults>
</compile_context>

<pallas_src>
import functools

import jax
import jax.numpy as jnp
from jax import lax
from jax.experimental import pallas as pl
from jax.experimental.pallas import tpu as pltpu


def _int_pow(v, m: int):
    """x**m for integer m via VALU multiplies (never touches the EUP)."""
    if m == 1:
        return v
    if m == 2:
        return v * v
    if m == 3:
        return v * v * v
    if m == 4:
        v2 = v * v
        return v2 * v2
    return v ** m            # Python int exponent -> lax.integer_pow (VALU)


def _gmean_kernel(x_ref, o_ref, *, moment, inv_c, cs, fold):
    # x_ref: (TB, CR, LW) block; reduce over axis 1 (channels), streamed in
    # sublane-sized slabs so live vector state stays ~2 output-sized tiles.
    tb, cr, lw = x_ref.shape
    is_int_moment = isinstance(moment, int)

    def powm(v):
        if is_int_moment:
            return _int_pow(v, moment)
        # Fractional moment: exp/log form of v**moment (NaN for v < 0, matching
        # torch.pow semantics for fractional exponents).
        return jnp.exp(jnp.log(v) * moment)

    def slab_sum(acc, start, size):
        slab = x_ref[:, pl.ds(start, size), :].astype(jnp.float32)
        return acc + jnp.sum(powm(slab), axis=1)

    acc = jnp.zeros((tb, lw), jnp.float32)
    n_full = cr // cs
    rem = cr - n_full * cs

    if n_full > 0:
        def body(i, a):
            start = pl.multiple_of(i * cs, cs)
            return slab_sum(a, start, cs)
        unroll = True if n_full <= 16 else 8
        acc = lax.fori_loop(0, n_full, body, acc, unroll=unroll)
    if rem > 0:
        acc = slab_sum(acc, n_full * cs, rem)

    # Small-HW path: k folded channel segments along the lane axis.
    if fold > 1:
        hw = lw // fold
        out = acc[:, :hw]
        for j in range(1, fold):
            out = out + acc[:, j * hw:(j + 1) * hw]
    else:
        out = acc

    pm = out * inv_c
    if moment == 1:
        r = pm
    elif moment == 2:
        r = jnp.sqrt(pm)
    elif moment == 4:
        r = jnp.sqrt(jnp.sqrt(pm))
    else:
        # exp/log form of pm ** (1/moment); matches pow's NaN for pm < 0.
        r = jnp.exp(jnp.log(pm) * (1.0 / moment))
    o_ref[...] = r.astype(o_ref.dtype)


def _is_v7x() -> bool:
    try:
        kind = jax.devices()[0].device_kind.lower()
    except Exception:
        return False
    return ("v7" in kind) or ("7x" in kind)


def _smallest_fold(c: int, hw: int, target: int = 128) -> int:
    """Smallest divisor k of c with k*hw >= target (falls back to c)."""
    if hw >= target or c <= 1:
        return 1
    need = -(-target // hw)            # ceil(target / hw)
    for k in range(need, c + 1):
        if c % k == 0:
            return k
    return c


def _choose_thw(tb: int, cr: int, lw: int, itemsize: int, is_v7x: bool) -> int:
    """Lane-tile size for the fold==1 path (multiple of 128, or full extent)."""
    row_bytes = tb * cr * itemsize     # bytes per unit of lane width
    base = 8 << 20                     # default per-(single)-buffer budget
    full_cap = (16 << 20) if is_v7x else (24 << 20)
    if row_bytes * lw <= base:
        return lw
    # Spend extra VMEM only when it makes each batch row's DMA fully contiguous.
    if row_bytes * lw <= full_cap:
        return lw
    thw = max((base // row_bytes) // 128 * 128, 128)
    return min(thw, lw)


def gmean(x: jax.Array, moment=2) -> jax.Array:
    """x: (B, C, H, W) float array -> (B, H, W) = mean(x**m, dim=1) ** (1/m)."""
    if moment == 0:
        raise ValueError("GMean: moment must be nonzero.")
    if isinstance(moment, float) and float(moment).is_integer():
        moment = int(moment)           # keep x**m on the VALU, not the EUP

    B, C, H, W = x.shape
    HW = H * W
    itemsize = jnp.dtype(x.dtype).itemsize
    is_v7x = _is_v7x()

    # GeM regime (large C, tiny HW): fold channels into the lane axis.
    fold = _smallest_fold(C, HW) if HW < 128 else 1
    CR, LW = C // fold, HW * fold
    x_flat = x.reshape(B, CR, LW)

    TB = 8 if B >= 8 else B            # 8 sublanes -> unmasked output stores
    if fold > 1:
        THW = LW                       # folded lane axis can't be tiled at 128
        cap = (16 << 20) if is_v7x else (24 << 20)
        while TB > 1 and TB * CR * THW * itemsize > cap:
            TB //= 2
        # TODO(synk): if even TB == 1 exceeds the VMEM budget, add a channel-grid
        # reduction (accumulate partial sums across CR blocks) instead.
    else:
        THW = _choose_thw(TB, CR, LW, itemsize, is_v7x)
    OTW = THW // fold                  # output lane-tile (== HW when folded)

    n_b, n_s = pl.cdiv(B, TB), pl.cdiv(LW, THW)

    # Streaming slab height: one sublane tile of the input dtype.
    cs = max(8, 32 // itemsize)

    blk_bytes = TB * CR * THW * itemsize
    vmem_limit = min((48 << 20) if is_v7x else (64 << 20),
                     max(32 << 20, 2 * blk_bytes + (8 << 20)))

    # v7x: explicitly shard the larger grid axis across both TensorCores.
    sem = [pltpu.PARALLEL, pltpu.PARALLEL]
    if is_v7x:
        big = 0 if n_b >= n_s else 1
        if (n_b, n_s)[big] > 1:
            sem[big] = pltpu.CORE_PARALLEL

    int_m = isinstance(moment, int)
    cost = pl.CostEstimate(
        flops=int(2 * B * C * HW),
        transcendentals=int(B * HW if int_m else B * C * HW + B * HW),
        bytes_accessed=int(B * C * HW * itemsize + B * HW * itemsize),
    )

    kernel = functools.partial(_gmean_kernel, moment=moment, inv_c=1.0 / C,
                               cs=cs, fold=fold)

    out_flat = pl.pallas_call(
        kernel,
        out_shape=jax.ShapeDtypeStruct((B, HW), x.dtype),
        grid=(n_b, n_s),
        in_specs=[pl.BlockSpec((TB, CR, THW), lambda b, s: (b, 0, s))],
        out_specs=pl.BlockSpec((TB, OTW), lambda b, s: (b, s)),
        compiler_params=pltpu.CompilerParams(
            dimension_semantics=tuple(sem),
            vmem_limit_bytes=vmem_limit,
        ),
        cost_estimate=cost,
    )(x_flat)

    return out_flat.reshape(B, H, W)


if __name__ == "__main__":
    key = jax.random.PRNGKey(0)
    k1, k2, k3 = jax.random.split(key, 3)

    # 1) Module-default config: moment=2, NCHW (2, 4, 16, 16).
    x1 = jax.random.normal(k1, (2, 4, 16, 16), dtype=jnp.float32)
    out1 = gmean(x1, moment=2)
    jax.block_until_ready(out1)
    ref1 = jnp.mean(x1 ** 2, axis=1) ** 0.5
    assert out1.shape == (2, 16, 16)
    assert jnp.allclose(out1, ref1, atol=1e-5, rtol=1e-5)

    # 2) GeM-style small-HW regime (exercises the channel->lane fold path) with
    #    a generic odd moment; positive inputs keep the fractional root real.
    x2 = jax.random.uniform(k2, (2, 16, 7, 7), dtype=jnp.float32) + 0.5
    out2 = gmean(x2, moment=3)
    jax.block_until_ready(out2)
    ref2 = jnp.mean(x2 ** 3, axis=1) ** (1.0 / 3.0)
    assert out2.shape == (2, 7, 7)
    assert jnp.allclose(out2, ref2, atol=1e-5, rtol=1e-4)

    # 3) Larger C and B (exercises the streamed sublane-slab reduction loop and
    #    the 8-sublane dense-store output tile).
    x3 = jax.random.normal(k3, (8, 32, 16, 16), dtype=jnp.float32)
    out3 = gmean(x3, moment=2)
    jax.block_until_ready(out3)
    ref3 = jnp.mean(x3 ** 2, axis=1) ** 0.5
    assert out3.shape == (8, 16, 16)
    assert jnp.allclose(out3, ref3, atol=1e-5, rtol=1e-5)

    print("KERNEL_OK")
</pallas_src>

<mosaic_0001>
module attributes {stable_mosaic.version = 11 : i64} {
  func.func @_gmean_kernel(%arg0: i32, %arg1: i32, %arg2: memref<2x4x256xf32, #tpu.memory_space<vmem>>, %arg3: memref<2x256xf32, #tpu.memory_space<vmem>>) attributes {dimension_semantics = [#tpu.dimension_semantics<parallel>, #tpu.dimension_semantics<parallel>], iteration_bounds = array<i64: 1, 1>, scalar_prefetch = 0 : i64, scratch_operands = 0 : i64, tpu.core_type = #tpu.core_type<tc>, window_params = [{transform_indices = @transform_0, window_bounds = array<i64: 2, 4, 256>}, {transform_indices = @transform_1, window_bounds = array<i64: 2, 256>}]} {
    %cst = arith.constant 0.000000e+00 : f32
    %0 = vector.broadcast %cst : f32 to vector<2x256xf32>
    %c0 = arith.constant 0 : index
    %c0_0 = arith.constant 0 : index
    %c0_1 = arith.constant 0 : index
    %1 = vector.load %arg2[%c0, %c0_0, %c0_1] : memref<2x4x256xf32, #tpu.memory_space<vmem>>, vector<2x4x256xf32>
    %2 = arith.mulf %1, %1 : vector<2x4x256xf32>
    %cst_2 = arith.constant dense<0.000000e+00> : vector<2x256xf32>
    %3 = vector.multi_reduction <add>, %2, %cst_2 [1] : vector<2x4x256xf32> to vector<2x256xf32>
    %4 = arith.addf %0, %3 : vector<2x256xf32>
    %cst_3 = arith.constant 2.500000e-01 : f32
    %5 = vector.broadcast %cst_3 : f32 to vector<2x256xf32>
    %6 = arith.mulf %4, %5 : vector<2x256xf32>
    %7 = math.sqrt %6 : vector<2x256xf32>
    %c0_4 = arith.constant 0 : index
    %c0_5 = arith.constant 0 : index
    %8 = vector.load %arg3[%c0_4, %c0_5] : memref<2x256xf32, #tpu.memory_space<vmem>>, vector<2x256xf32>
    tpu.vector_store %arg3[%c0_4, %c0_5], %7 {strides = array<i32>} : memref<2x256xf32, #tpu.memory_space<vmem>>, vector<2x256xf32>,
    return
  }
  func.func @transform_0(%arg0: i32, %arg1: i32) -> (i32, i32, i32) {
    %c0_i32 = arith.constant 0 : i32
    %c0_i32_0 = arith.constant 0 : i32
    return %arg0, %c0_i32, %arg1 : i32, i32, i32
  }
  func.func @transform_1(%arg0: i32, %arg1: i32) -> (i32, i32) {
    %c0_i32 = arith.constant 0 : i32
    return %arg0, %arg1 : i32, i32
  }
}

</mosaic_0001>

<bundles_post_ra>
// kernel: tpu_custom_call.1
= control target key start
LH: loop header
LB: loop body
LE: loop exit
PB: predicated region body
PF: predicated region fallthrough
CT: control target
= control target key end

     0   :  { %6 = vsyncpa [#allocation3], 0  ;;  %s228_s0 = inlined_call_operand.hbm [shape: f32[2,4,256], index: 0, kind: input, shape index: {}]   ;;  %s229_s1 = inlined_call_operand.hbm [shape: f32[2,256], index: 1, kind: output, shape index: {}]  }
   0x1   :  { %7 = vsyncpa [#allocation4], 0  ;;  %s205_s6 = smov [#allocation2]  }
   0x2   :  { %s13_s7 = sshll.u32 %s205_s6, 4  ;;  %s14_s7 = int_to_ptr.vmem [resolvable:$true] %s13_s7 }
   0x3   :  { %s169_s8 = scalar_lea.vmem %s14_s7, 256  ;;  %p174_p1 = scmp.lt.s32.totalorder %s14_s7, %s14_s7 }
   0x4   :  { %p170_p0 = scmp.ne.s32.totalorder %s14_s7, %s169_s8  ;;  %p175_p2 = scmp.lt.s32.totalorder %s169_s8, %s169_s8 }
   0x6   :  { %p176_p3 = por %p175_p2, %p174_p1 }
   0x8   :  { %p177_p4 = pnand %p176_p3, %p170_p0 }
   0xa   :  { %180 = shalt.err (!%p177_p4)
}
   0xb   :  { %s206_s9 = smov 128   ;;  %s207_s10 = smov 8  }
   0xc   :  { %19 = dma.hbm_to_vmem [thread:$0]  %s228_s0, 256, %s14_s7, [#allocation3], %s206_s9, %s206_s9, %s207_s10  }
   0xd   :  { %201 = dma.done.wait [#allocation3], 256  }
   0xe   :  { %202 = vsyncadd [#allocation3], 4294967040  ;;  %v23_v0 = vld [vmem:[#allocation2] sm:$0xff]  ;;  %v24_v1 = vld [vmem:[#allocation2 + $0x8] sm:$0xff]  ;;  %vm33_vm0 = vcmask 1043456   ;;  %v106_v38 = vlaneseq  ;;  %vm123_vm9 = vcmask 1041409  }
   0xf   :  { %v25_v2 = vmul.f32 %v23_v0, %v23_v0  ;;  %v26_v3 = vmul.f32 %v24_v1, %v24_v1  ;;  %v208_v39 = vmov 1983009808   ;;  %vm125_vm10 = vcmask 1043459   ;;  %s209_s0 = smov [#allocation5]  }
  0x10   :  { %v104_v40 = vunpack.c.l.s4 %v208_v39  ;;  %v107_v41 = vshrl.u32 %v106_v38, 7  ;;  %vm127_vm11 = vcmask 1045509   ;;  %s139_s13 = sshll.u32 %s209_s0, 4  ;;  %vm129_vm12 = vcmask 1047559   ;;  %s140_s13 = int_to_ptr.vmem [resolvable:$true] %s139_s13 }
  0x11   :  { %v29_v4 = vcombine.high %v25_v2, %v25_v2  ;;  %v30_v5 = vcombine.high %v26_v3, %v26_v3  ;;  %v34_v6 = vsel %vm33_vm0, %v25_v2, 0.0  ;;  %v48_v7 = vsel %vm33_vm0, %v26_v3, 0.0  ;;  %s181_s14 = scalar_lea.vmem %s140_s13, 64  ;;  %p186_p6 = scmp.lt.s32.totalorder %s140_s13, %s140_s13 }
  0x12   :  { %v35_v8 = vrot.slane %v34_v6, 4  ;;  %v49_v9 = vrot.slane %v48_v7, 4  ;;  %v105_v44 = vunpack.c.0.s8 %v104_v40  ;;  %p182_p5 = scmp.ne.s32.totalorder %s140_s13, %s181_s14  ;;  %p187_p7 = scmp.lt.s32.totalorder %s181_s14, %s181_s14 }
  0x13   :  { %v41_v10 = vsel %vm33_vm0, %v29_v4, 0.0  ;;  %v55_v11 = vsel %vm33_vm0, %v30_v5, 0.0 }
  0x14   :  { %v36_v12 = vadd.f32 %v35_v8, %v34_v6  ;;  %v42_v13 = vrot.slane %v41_v10, 4  ;;  %v50_v14 = vadd.f32 %v49_v9, %v48_v7  ;;  %v56_v15 = vrot.slane %v55_v11, 4  ;;  %p188_p8 = por %p187_p7, %p186_p6 }
  0x15   :  { %v108_v62 = vsub.s32 %v105_v44, %v107_v41 }
  0x16   :  { %v37_v16 = vrot.slane %v36_v12, 2  ;;  %v43_v17 = vadd.f32 %v42_v13, %v41_v10  ;;  %v51_v18 = vrot.slane %v50_v14, 2  ;;  %v57_v19 = vadd.f32 %v56_v15, %v55_v11  ;;  %p189_p9 = pnand %p188_p8, %p182_p5 }
  0x18   :  { %v38_v20 = vadd.f32 %v37_v16, %v36_v12  ;;  %v44_v21 = vrot.slane %v43_v17, 2  ;;  %v52_v22 = vadd.f32 %v51_v18, %v50_v14  ;;  %v58_v23 = vrot.slane %v57_v19, 2 }
  0x1a   :  { %v39_v24 = vrot.slane %v38_v20, 1  ;;  %v45_v25 = vadd.f32 %v44_v21, %v43_v17  ;;  %v53_v26 = vrot.slane %v52_v22, 1  ;;  %v59_v27 = vadd.f32 %v58_v23, %v57_v19 }
  0x1c   :  { %v40_v28 = vadd.f32 %v39_v24, %v38_v20  ;;  %v46_v29 = vrot.slane %v45_v25, 1  ;;  %v54_v30 = vadd.f32 %v53_v26, %v52_v22  ;;  %v60_v31 = vrot.slane %v59_v27, 1 }
  0x1e   :  { %v47_v32 = vadd.f32 %v46_v29, %v45_v25  ;;  %v61_v33 = vadd.f32 %v60_v31, %v59_v27  ;;  %v66_v34 = vmul.f32 0.25, %v40_v28  ;;  %v68_v35 = vmul.f32 0.25, %v54_v30 }
  0x20   :  { %v67_v36 = vmul.f32 0.25, %v47_v32  ;;  %v69_v37 = vmul.f32 0.25, %v61_v33  ;;  %153 = vrsqrt.f32 %v66_v34  ;;  %vm72_vm1 = vcmp.eq.f32.partialorder %v66_v34, inf }
  0x21   :  { %155 = vrsqrt.f32 %v68_v35  ;;  %vm74_vm2 = vcmp.eq.f32.partialorder %v66_v34, 0.0  ;;  %v75_v43 = vand.u32 2147483648, %v66_v34  ;;  %vm86_vm4 = vcmp.eq.f32.partialorder %v68_v35, inf }
  0x22   :  { %157 = vrsqrt.f32 %v67_v36  ;;  %vm79_vm3 = vcmp.eq.f32.partialorder %v67_v36, inf  ;;  %v89_v47 = vand.u32 2147483648, %v68_v35  ;;  %vm81_vm5 = vcmp.eq.f32.partialorder %v67_v36, 0.0 }
  0x23   :  { %159 = vrsqrt.f32 %v69_v37  ;;  %v82_v49 = vand.u32 2147483648, %v67_v36  ;;  %vm88_vm6 = vcmp.eq.f32.partialorder %v68_v35, 0.0  ;;  %vm93_vm7 = vcmp.eq.f32.partialorder %v69_v37, inf }
  0x24   :  { %v96_v54 = vand.u32 2147483648, %v69_v37  ;;  %vm95_vm8 = vcmp.eq.f32.partialorder %v69_v37, 0.0 }
  0x2d   :  { %v154_v42 = vpop.eup %153 }
  0x2e   :  { %v156_v45 = vpop.eup %155  ;;  %v71_v46 = vmul.f32 %v154_v42, %v66_v34 }
  0x2f   :  { %v158_v48 = vpop.eup %157  ;;  %v85_v50 = vmul.f32 %v156_v45, %v68_v35 }
  0x30   :  { %v160_v51 = vpop.eup %159  ;;  %v73_v52 = vsel %vm72_vm1, %v66_v34, %v71_v46  ;;  %v78_v53 = vmul.f32 %v158_v48, %v67_v36 }
  0x31   :  { %v76_v55 = vsel %vm74_vm2, %v75_v43, %v73_v52  ;;  %v87_v56 = vsel %vm86_vm4, %v68_v35, %v85_v50  ;;  %v92_v57 = vmul.f32 %v160_v51, %v69_v37 }
  0x32   :  { %v80_v58 = vsel %vm79_vm3, %v67_v36, %v78_v53  ;;  %v90_v59 = vsel %vm88_vm6, %v89_v47, %v87_v56 }
  0x33   :  { %v83_v60 = vsel %vm81_vm5, %v82_v49, %v80_v58  ;;  %v94_v61 = vsel %vm93_vm7, %v69_v37, %v92_v57 }
  0x34   :  { %v97_v63 = vsel %vm95_vm8, %v96_v54, %v94_v61  ;;  %v102_v0 = vcombine.low %v76_v55, %v83_v60 }
  0x35   :  { %v110_v1 = vcombine.low %v90_v59, %v97_v63 }
  0x36   :  { %v109_v2 = vrot.slane %v102_v0, %v108_v62 }
  0x37   :  { %v117_v3 = vrot.slane %v110_v1, %v108_v62 }
  0x39   :  { %v122_v4 = vrot.slane %v117_v3, 7 }
  0x3b   :  { %v124_v5 = vsel %vm123_vm9, %v122_v4, %v109_v2 }
  0x3c   :  { %v126_v6 = vsel %vm125_vm10, %v122_v4, %v124_v5 }
  0x3d   :  { %v128_v7 = vsel %vm127_vm11, %v122_v4, %v126_v6 }
  0x3e   :  { %v130_v8 = vsel %vm129_vm12, %v122_v4, %v128_v7 }
  0x3f   :  { %132 = vst [vmem:[#allocation5] sm:$0xf] %v130_v8 }
  0x40   :  { %192 = shalt.err (!%p189_p9)
}
  0x41   :  { %142 = dma.vmem_to_hbm [thread:$0]  %s140_s13, 64, %s229_s1, [#allocation4]  }
  0x42   :  { %203 = dma.done.wait [#allocation4], 64  }
  0x43   :  { %204 = vsyncadd [#allocation4], 4294967232 }
  0x44   :  { %146 = vsyncpa [#allocation3], 1 }
  0x45   :  { %147 = vsyncpa [#allocation4], 1 }

</bundles_post_ra>
